<compile_context>
chip_gen: v7x
topology: tpu7x:2x2x1
jax: 0.10.0
libtpu: 0.0.40
codegen_flags: <defaults>
</compile_context>

<pallas_src>
import functools

import jax
import jax.numpy as jnp
from jax.experimental import pallas as pl
from jax.experimental.pallas import tpu as pltpu


def _sigmoid(x):
    return 1.0 / (1.0 + jnp.exp(-x))


def _round_up(x, m):
    return ((x + m - 1) // m) * m


# ----------------------------- tiny channel MLP --------------------------------
def _mlp_branch(v3, w1, b1, w2t, b2r):
    """One MLP branch.  v3: (1, C, 1); w1: (C, Ch); b1: (1, Ch); w2t: (C, Ch);
    b2r: (1, C, 1).  Returns (1, C, 1).  Pure VPU broadcast + reduce (no MXU)."""
    h = jnp.maximum(jnp.sum(v3 * w1[None, :, :], axis=1) + b1, 0.0)      # (1, Ch)
    y = jnp.sum(h[:, None, :] * w2t[None, :, :], axis=-1, keepdims=True)  # (1, C, 1)
    return y + b2r


def _channel_mlp(avg3, max3, w1, b1, w2t, b2r):
    """sigmoid(mlp(avg) + mlp(max)) -> channel attention, shape (1, C, 1)."""
    return _sigmoid(_mlp_branch(avg3, w1, b1, w2t, b2r)
                    + _mlp_branch(max3, w1, b1, w2t, b2r))


# ------------------------ fused single-pass kernel ------------------------------
def _fused_kernel(w1_ref, b1_ref, w2t_ref, b2_ref, wc_ref, x_ref, o_ref,
                  *, inv_hw, inv_c):
    # x_ref/o_ref: (1, C, HW) — the whole per-batch slab is resident in VMEM.
    x = x_ref[...]
    avg3 = jnp.sum(x, axis=-1, keepdims=True) * inv_hw                   # (1, C, 1)
    max3 = jnp.max(x, axis=-1, keepdims=True)                            # (1, C, 1)
    ca3 = _channel_mlp(avg3, max3, w1_ref[...], b1_ref[...],
                       w2t_ref[...], b2_ref[...])                        # (1, C, 1)
    t = x * ca3                                                          # channel gate
    s_max = jnp.max(t, axis=1, keepdims=True)                            # (1, 1, HW)
    s_mean = jnp.sum(t, axis=1, keepdims=True) * inv_c                   # (1, 1, HW)
    sa = _sigmoid(wc_ref[0] * s_max + wc_ref[1] * s_mean)                # spatial gate
    o_ref[...] = t * sa


# ----------------- streaming pass 1: pooling + in-kernel MLP --------------------
def _pool_kernel(w1_ref, b1_ref, w2t_ref, b2_ref, x_ref, ca_ref,
                 sum_sc, max_sc, *, hw, hw_tile, ragged, inv_hw):
    # x_ref: (1, C, hw_tile); ca_ref: (1, C, 1) written only at the last tile.
    s = pl.program_id(1)
    x = x_ref[...]

    if ragged:
        lane = jax.lax.broadcasted_iota(jnp.int32, x.shape, 2) + s * hw_tile
        valid = lane < hw
        x_sum = jnp.where(valid, x, 0.0)       # mask pads for the sum
        x_max = jnp.where(valid, x, -jnp.inf)  # mask pads for the max
    else:
        x_sum = x
        x_max = x

    tile_sum = jnp.sum(x_sum, axis=-1, keepdims=True)   # (1, C, 1)
    tile_max = jnp.max(x_max, axis=-1, keepdims=True)   # (1, C, 1)

    @pl.when(s == 0)
    def _():
        sum_sc[...] = tile_sum
        max_sc[...] = tile_max

    @pl.when(s > 0)
    def _():
        sum_sc[...] = sum_sc[...] + tile_sum
        max_sc[...] = jnp.maximum(max_sc[...], tile_max)

    @pl.when(s == pl.num_programs(1) - 1)
    def _():
        ca_ref[...] = _channel_mlp(sum_sc[...] * inv_hw, max_sc[...],
                                   w1_ref[...], b1_ref[...],
                                   w2t_ref[...], b2_ref[...])


# ------------- streaming pass 2: apply channel + spatial attention --------------
def _apply_kernel(ca_ref, wc_ref, x_ref, o_ref, *, inv_c):
    # ca_ref: (1, C, 1); wc_ref: (2,) SMEM scalars; x_ref/o_ref: (1, C, hw_tile).
    x = x_ref[...]
    t = x * ca_ref[...]
    s_max = jnp.max(t, axis=1, keepdims=True)
    s_mean = jnp.sum(t, axis=1, keepdims=True) * inv_c
    sa = _sigmoid(wc_ref[0] * s_max + wc_ref[1] * s_mean)
    o_ref[...] = t * sa
    # (ragged last tile: out-of-bounds lanes are dropped by the partial store)


# ----------------------------------- wrapper ------------------------------------
def attention_block(x_nchw, w1, b1, w2, b2, wconv, *,
                    fuse_slab_limit_bytes=4 << 20,   # per-batch slab cap for fusion
                    target_block_bytes=4 << 20,      # per-step x block (streaming)
                    force_streaming=False):
    """x_nchw: (B, C, H, W) float32.  Returns (B, C, H, W)."""
    B, C, H, W = x_nchw.shape
    hw = H * W
    Ch = w1.shape[1]

    x = x_nchw.reshape(B, C, hw).astype(jnp.float32)
    w1f = w1.astype(jnp.float32)                     # (C, Ch)
    b1r = b1.reshape(1, Ch).astype(jnp.float32)      # (1, Ch)
    w2t = w2.T.astype(jnp.float32)                   # (C, Ch): transposed so the
    #                                                  second layer reduces lanes
    b2r = b2.reshape(1, C, 1).astype(jnp.float32)    # (1, C, 1)
    wc = wconv.reshape(2).astype(jnp.float32)        # Conv2d(2,1,1) weights: (max, mean)

    vmem_limit = 48 << 20  # fits scoped VMEM on v5e/v6e (128 MiB) and v7x (64 MiB)
    slab_bytes = C * hw * 4

    if (not force_streaming) and slab_bytes <= fuse_slab_limit_bytes:
        # ---- fused single-pass path: x read once, written once ----
        out = pl.pallas_call(
            functools.partial(_fused_kernel, inv_hw=1.0 / hw, inv_c=1.0 / C),
            grid=(B,),
            in_specs=[
                pl.BlockSpec((C, Ch), lambda b: (0, 0)),
                pl.BlockSpec((1, Ch), lambda b: (0, 0)),
                pl.BlockSpec((C, Ch), lambda b: (0, 0)),
                pl.BlockSpec((1, C, 1), lambda b: (0, 0, 0)),
                pl.BlockSpec(memory_space=pltpu.MemorySpace.SMEM),
                pl.BlockSpec((1, C, hw), lambda b: (b, 0, 0)),
            ],
            out_specs=pl.BlockSpec((1, C, hw), lambda b: (b, 0, 0)),
            out_shape=jax.ShapeDtypeStruct((B, C, hw), jnp.float32),
            compiler_params=pltpu.CompilerParams(
                dimension_semantics=("parallel",),
                vmem_limit_bytes=vmem_limit),
        )(w1f, b1r, w2t, b2r, wc, x)
        return out.reshape(B, C, H, W)

    # ---- streaming two-pass fallback (large slabs): no HBM padding round trip ----
    hw_tile = max(128, min(_round_up(hw, 128),
                           (target_block_bytes // (4 * C)) // 128 * 128))
    num_s = pl.cdiv(hw, hw_tile)
    ragged = (hw % hw_tile) != 0

    # Pass 1: streamed pooling + in-kernel channel MLP -> ca (B, C, 1).
    ca3 = pl.pallas_call(
        functools.partial(_pool_kernel, hw=hw, hw_tile=hw_tile,
                          ragged=ragged, inv_hw=1.0 / hw),
        grid=(B, num_s),
        in_specs=[
            pl.BlockSpec((C, Ch), lambda b, s: (0, 0)),
            pl.BlockSpec((1, Ch), lambda b, s: (0, 0)),
            pl.BlockSpec((C, Ch), lambda b, s: (0, 0)),
            pl.BlockSpec((1, C, 1), lambda b, s: (0, 0, 0)),
            pl.BlockSpec((1, C, hw_tile), lambda b, s: (b, 0, s)),
        ],
        out_specs=pl.BlockSpec((1, C, 1), lambda b, s: (b, 0, 0)),
        out_shape=jax.ShapeDtypeStruct((B, C, 1), jnp.float32),
        scratch_shapes=[pltpu.VMEM((1, C, 1), jnp.float32),
                        pltpu.VMEM((1, C, 1), jnp.float32)],
        compiler_params=pltpu.CompilerParams(
            dimension_semantics=("parallel", "arbitrary"),
            vmem_limit_bytes=vmem_limit),
    )(w1f, b1r, w2t, b2r, x)

    # Pass 2: streamed apply (fully parallel grid).
    out = pl.pallas_call(
        functools.partial(_apply_kernel, inv_c=1.0 / C),
        grid=(B, num_s),
        in_specs=[
            pl.BlockSpec((1, C, 1), lambda b, s: (b, 0, 0)),
            pl.BlockSpec(memory_space=pltpu.MemorySpace.SMEM),
            pl.BlockSpec((1, C, hw_tile), lambda b, s: (b, 0, s)),
        ],
        out_specs=pl.BlockSpec((1, C, hw_tile), lambda b, s: (b, 0, s)),
        out_shape=jax.ShapeDtypeStruct((B, C, hw), jnp.float32),
        compiler_params=pltpu.CompilerParams(
            dimension_semantics=("parallel", "parallel"),
            vmem_limit_bytes=vmem_limit),
    )(ca3, wc, x)

    return out.reshape(B, C, H, W)


# ----------------------------- pure-JAX reference -------------------------------
def reference(x_nchw, w1, b1, w2, b2, wconv):
    """Mirrors the PyTorch AttentionBlock.forward."""
    avg_in = jnp.mean(x_nchw, axis=(2, 3))                 # (B, C)
    max_in = jnp.max(x_nchw, axis=(2, 3))                  # (B, C)

    def mlp(v):
        h = jnp.maximum(v @ w1 + b1, 0.0)
        return h @ w2 + b2

    ca = jax.nn.sigmoid(mlp(avg_in) + mlp(max_in))         # (B, C)
    temp = x_nchw * ca[:, :, None, None]
    s_max = jnp.max(temp, axis=1)                          # (B, H, W)
    s_mean = jnp.mean(temp, axis=1)                        # (B, H, W)
    sa = jax.nn.sigmoid(wconv[0] * s_max + wconv[1] * s_mean)
    return temp * sa[:, None, :, :]


if __name__ == "__main__":
    key = jax.random.PRNGKey(0)
    kx, k1, k2, k3, k4, k5, kx2 = jax.random.split(key, 7)

    B, C, H, W = 2, 8, 16, 16
    ratio = 2
    Ch = C // ratio

    x = jax.random.normal(kx, (B, C, H, W), dtype=jnp.float32)
    # PyTorch Linear stores weight as (out, in); we keep (in, out) for x @ W.
    w1 = jax.random.normal(k1, (C, Ch), dtype=jnp.float32) * 0.2
    b1 = jax.random.normal(k2, (Ch,), dtype=jnp.float32) * 0.1
    w2 = jax.random.normal(k3, (Ch, C), dtype=jnp.float32) * 0.2
    b2 = jax.random.normal(k4, (C,), dtype=jnp.float32) * 0.1
    wconv = jax.random.normal(k5, (2,), dtype=jnp.float32) * 0.5  # Conv2d(2,1,1), (max, mean)

    # 1) Fused single-pass path (small per-batch slab -> x read once).
    out = attention_block(x, w1, b1, w2, b2, wconv)
    out = jax.block_until_ready(out)
    ref = reference(x, w1, b1, w2, b2, wconv)
    assert out.shape == (B, C, H, W)
    assert jnp.allclose(out, ref, atol=1e-5, rtol=1e-5), "fused path mismatch vs reference"

    # 2) Streaming two-pass fallback with a ragged last spatial tile
    #    (H*W = 400, tile = 128 -> 4 tiles, last one masked; no HBM padding).
    H2 = W2 = 20
    x2 = jax.random.normal(kx2, (B, C, H2, W2), dtype=jnp.float32)
    out2 = attention_block(x2, w1, b1, w2, b2, wconv,
                           force_streaming=True, target_block_bytes=4 * C * 128)
    out2 = jax.block_until_ready(out2)
    ref2 = reference(x2, w1, b1, w2, b2, wconv)
    assert out2.shape == (B, C, H2, W2)
    assert jnp.allclose(out2, ref2, atol=1e-5, rtol=1e-5), "streaming path mismatch vs reference"

    print("KERNEL_OK")
</pallas_src>

<mosaic_0001>
module attributes {stable_mosaic.version = 11 : i64} {
  func.func @_fused_kernel(%arg0: i32, %arg1: memref<8x4xf32, #tpu.memory_space<vmem>>, %arg2: memref<1x4xf32, #tpu.memory_space<vmem>>, %arg3: memref<8x4xf32, #tpu.memory_space<vmem>>, %arg4: memref<1x8x1xf32, #tpu.memory_space<vmem>>, %arg5: memref<2xf32, #tpu.memory_space<smem>>, %arg6: memref<1x8x256xf32, #tpu.memory_space<vmem>>, %arg7: memref<1x8x256xf32, #tpu.memory_space<vmem>>) attributes {dimension_semantics = [#tpu.dimension_semantics<parallel>], iteration_bounds = array<i64: 2>, scalar_prefetch = 0 : i64, scratch_operands = 0 : i64, tpu.core_type = #tpu.core_type<tc>, window_params = [{pipeline_mode = #tpu.pipeline_mode<synchronous>, transform_indices = @transform_0, window_bounds = array<i64: 8, 4>}, {pipeline_mode = #tpu.pipeline_mode<synchronous>, transform_indices = @transform_1, window_bounds = array<i64: 1, 4>}, {pipeline_mode = #tpu.pipeline_mode<synchronous>, transform_indices = @transform_2, window_bounds = array<i64: 8, 4>}, {pipeline_mode = #tpu.pipeline_mode<synchronous>, transform_indices = @transform_3, window_bounds = array<i64: 1, 8, 1>}, {transform_indices = @transform_4, window_bounds = array<i64: 2>}, {transform_indices = @transform_5, window_bounds = array<i64: 1, 8, 256>}, {transform_indices = @transform_6, window_bounds = array<i64: 1, 8, 256>}]} {
    %c0 = arith.constant 0 : index
    %c0_0 = arith.constant 0 : index
    %c0_1 = arith.constant 0 : index
    %0 = vector.load %arg6[%c0, %c0_0, %c0_1] : memref<1x8x256xf32, #tpu.memory_space<vmem>>, vector<1x8x256xf32>
    %cst = arith.constant dense<0.000000e+00> : vector<1x8xf32>
    %1 = vector.multi_reduction <add>, %0, %cst [2] : vector<1x8x256xf32> to vector<1x8xf32>
    %2 = vector.shape_cast %1 : vector<1x8xf32> to vector<1x8x1xf32>
    %cst_2 = arith.constant 3.906250e-03 : f32
    %3 = vector.broadcast %cst_2 : f32 to vector<1x8x1xf32>
    %4 = arith.mulf %2, %3 : vector<1x8x1xf32>
    %cst_3 = arith.constant dense<0xFF800000> : vector<1x8xf32>
    %5 = vector.multi_reduction <maximumf>, %0, %cst_3 [2] : vector<1x8x256xf32> to vector<1x8xf32>
    %6 = vector.shape_cast %5 : vector<1x8xf32> to vector<1x8x1xf32>
    %c0_4 = arith.constant 0 : index
    %c0_5 = arith.constant 0 : index
    %7 = vector.load %arg1[%c0_4, %c0_5] : memref<8x4xf32, #tpu.memory_space<vmem>>, vector<8x4xf32>
    %c0_6 = arith.constant 0 : index
    %c0_7 = arith.constant 0 : index
    %8 = vector.load %arg2[%c0_6, %c0_7] : memref<1x4xf32, #tpu.memory_space<vmem>>, vector<1x4xf32>
    %c0_8 = arith.constant 0 : index
    %c0_9 = arith.constant 0 : index
    %9 = vector.load %arg3[%c0_8, %c0_9] : memref<8x4xf32, #tpu.memory_space<vmem>>, vector<8x4xf32>
    %c0_10 = arith.constant 0 : index
    %c0_11 = arith.constant 0 : index
    %c0_12 = arith.constant 0 : index
    %10 = vector.load %arg4[%c0_10, %c0_11, %c0_12] : memref<1x8x1xf32, #tpu.memory_space<vmem>>, vector<1x8x1xf32>
    %11 = vector.shape_cast %7 : vector<8x4xf32> to vector<1x8x4xf32>
    %12 = vector.broadcast %4 : vector<1x8x1xf32> to vector<1x8x4xf32>
    %13 = arith.mulf %12, %11 : vector<1x8x4xf32>
    %cst_13 = arith.constant dense<0.000000e+00> : vector<1x4xf32>
    %14 = vector.multi_reduction <add>, %13, %cst_13 [1] : vector<1x8x4xf32> to vector<1x4xf32>
    %15 = arith.addf %14, %8 : vector<1x4xf32>
    %cst_14 = arith.constant 0.000000e+00 : f32
    %16 = vector.broadcast %cst_14 : f32 to vector<1x4xf32>
    %17 = arith.maximumf %15, %16 : vector<1x4xf32>
    %18 = vector.shape_cast %17 : vector<1x4xf32> to vector<1x1x4xf32>
    %19 = vector.shape_cast %9 : vector<8x4xf32> to vector<1x8x4xf32>
    %20 = vector.broadcast %18 : vector<1x1x4xf32> to vector<1x8x4xf32>
    %21 = arith.mulf %20, %19 : vector<1x8x4xf32>
    %cst_15 = arith.constant dense<0.000000e+00> : vector<1x8xf32>
    %22 = vector.multi_reduction <add>, %21, %cst_15 [2] : vector<1x8x4xf32> to vector<1x8xf32>
    %23 = vector.shape_cast %22 : vector<1x8xf32> to vector<1x8x1xf32>
    %24 = arith.addf %23, %10 : vector<1x8x1xf32>
    %25 = vector.shape_cast %7 : vector<8x4xf32> to vector<1x8x4xf32>
    %26 = vector.broadcast %6 : vector<1x8x1xf32> to vector<1x8x4xf32>
    %27 = arith.mulf %26, %25 : vector<1x8x4xf32>
    %cst_16 = arith.constant dense<0.000000e+00> : vector<1x4xf32>
    %28 = vector.multi_reduction <add>, %27, %cst_16 [1] : vector<1x8x4xf32> to vector<1x4xf32>
    %29 = arith.addf %28, %8 : vector<1x4xf32>
    %cst_17 = arith.constant 0.000000e+00 : f32
    %30 = vector.broadcast %cst_17 : f32 to vector<1x4xf32>
    %31 = arith.maximumf %29, %30 : vector<1x4xf32>
    %32 = vector.shape_cast %31 : vector<1x4xf32> to vector<1x1x4xf32>
    %33 = vector.shape_cast %9 : vector<8x4xf32> to vector<1x8x4xf32>
    %34 = vector.broadcast %32 : vector<1x1x4xf32> to vector<1x8x4xf32>
    %35 = arith.mulf %34, %33 : vector<1x8x4xf32>
    %cst_18 = arith.constant dense<0.000000e+00> : vector<1x8xf32>
    %36 = vector.multi_reduction <add>, %35, %cst_18 [2] : vector<1x8x4xf32> to vector<1x8xf32>
    %37 = vector.shape_cast %36 : vector<1x8xf32> to vector<1x8x1xf32>
    %38 = arith.addf %37, %10 : vector<1x8x1xf32>
    %39 = arith.addf %24, %38 : vector<1x8x1xf32>
    %cst_19 = arith.constant 0.000000e+00 : f32
    %40 = vector.broadcast %cst_19 : f32 to vector<1x8x1xf32>
    %41 = arith.subf %40, %39 : vector<1x8x1xf32>
    %42 = math.exp %41 : vector<1x8x1xf32>
    %cst_20 = arith.constant 1.000000e+00 : f32
    %43 = vector.broadcast %cst_20 : f32 to vector<1x8x1xf32>
    %44 = arith.addf %43, %42 : vector<1x8x1xf32>
    %cst_21 = arith.constant 1.000000e+00 : f32
    %45 = vector.broadcast %cst_21 : f32 to vector<1x8x1xf32>
    %46 = arith.divf %45, %44 : vector<1x8x1xf32>
    %47 = vector.broadcast %46 : vector<1x8x1xf32> to vector<1x8x256xf32>
    %48 = arith.mulf %0, %47 : vector<1x8x256xf32>
    %cst_22 = arith.constant dense<0xFF800000> : vector<1x256xf32>
    %49 = vector.multi_reduction <maximumf>, %48, %cst_22 [1] : vector<1x8x256xf32> to vector<1x256xf32>
    %50 = vector.shape_cast %49 : vector<1x256xf32> to vector<1x1x256xf32>
    %cst_23 = arith.constant dense<0.000000e+00> : vector<1x256xf32>
    %51 = vector.multi_reduction <add>, %48, %cst_23 [1] : vector<1x8x256xf32> to vector<1x256xf32>
    %52 = vector.shape_cast %51 : vector<1x256xf32> to vector<1x1x256xf32>
    %cst_24 = arith.constant 1.250000e-01 : f32
    %53 = vector.broadcast %cst_24 : f32 to vector<1x1x256xf32>
    %54 = arith.mulf %52, %53 : vector<1x1x256xf32>
    %c0_25 = arith.constant 0 : index
    %55 = memref.load %arg5[%c0_25] : memref<2xf32, #tpu.memory_space<smem>>
    %56 = vector.broadcast %55 : f32 to vector<1x1x256xf32>
    %57 = arith.mulf %56, %50 : vector<1x1x256xf32>
    %c1 = arith.constant 1 : index
    %58 = memref.load %arg5[%c1] : memref<2xf32, #tpu.memory_space<smem>>
    %59 = vector.broadcast %58 : f32 to vector<1x1x256xf32>
    %60 = arith.mulf %59, %54 : vector<1x1x256xf32>
    %61 = arith.addf %57, %60 : vector<1x1x256xf32>
    %cst_26 = arith.constant 0.000000e+00 : f32
    %62 = vector.broadcast %cst_26 : f32 to vector<1x1x256xf32>
    %63 = arith.subf %62, %61 : vector<1x1x256xf32>
    %64 = math.exp %63 : vector<1x1x256xf32>
    %cst_27 = arith.constant 1.000000e+00 : f32
    %65 = vector.broadcast %cst_27 : f32 to vector<1x1x256xf32>
    %66 = arith.addf %65, %64 : vector<1x1x256xf32>
    %cst_28 = arith.constant 1.000000e+00 : f32
    %67 = vector.broadcast %cst_28 : f32 to vector<1x1x256xf32>
    %68 = arith.divf %67, %66 : vector<1x1x256xf32>
    %69 = vector.broadcast %68 : vector<1x1x256xf32> to vector<1x8x256xf32>
    %70 = arith.mulf %48, %69 : vector<1x8x256xf32>
    %c0_29 = arith.constant 0 : index
    %c0_30 = arith.constant 0 : index
    %c0_31 = arith.constant 0 : index
    %71 = vector.load %arg7[%c0_29, %c0_30, %c0_31] : memref<1x8x256xf32, #tpu.memory_space<vmem>>, vector<1x8x256xf32>
    tpu.vector_store %arg7[%c0_29, %c0_30, %c0_31], %70 {strides = array<i32>} : memref<1x8x256xf32, #tpu.memory_space<vmem>>, vector<1x8x256xf32>,
    return
  }
  func.func @transform_0(%arg0: i32) -> (i32, i32) {
    %c0_i32 = arith.constant 0 : i32
    %c0_i32_0 = arith.constant 0 : i32
    %c0_i32_1 = arith.constant 0 : i32
    return %c0_i32, %c0_i32_0 : i32, i32
  }
  func.func @transform_1(%arg0: i32) -> (i32, i32) {
    %c0_i32 = arith.constant 0 : i32
    %c0_i32_0 = arith.constant 0 : i32
    %c0_i32_1 = arith.constant 0 : i32
    return %c0_i32, %c0_i32_0 : i32, i32
  }
  func.func @transform_2(%arg0: i32) -> (i32, i32) {
    %c0_i32 = arith.constant 0 : i32
    %c0_i32_0 = arith.constant 0 : i32
    %c0_i32_1 = arith.constant 0 : i32
    return %c0_i32, %c0_i32_0 : i32, i32
  }
  func.func @transform_3(%arg0: i32) -> (i32, i32, i32) {
    %c0_i32 = arith.constant 0 : i32
    %c0_i32_0 = arith.constant 0 : i32
    %c0_i32_1 = arith.constant 0 : i32
    %c0_i32_2 = arith.constant 0 : i32
    return %c0_i32, %c0_i32_0, %c0_i32_1 : i32, i32, i32
  }
  func.func @transform_4(%arg0: i32) -> i32 {
    %c0_i32 = arith.constant 0 : i32
    %c0_i32_0 = arith.constant 0 : i32
    return %c0_i32 : i32
  }
  func.func @transform_5(%arg0: i32) -> (i32, i32, i32) {
    %c0_i32 = arith.constant 0 : i32
    %c0_i32_0 = arith.constant 0 : i32
    %c0_i32_1 = arith.constant 0 : i32
    return %arg0, %c0_i32, %c0_i32_0 : i32, i32, i32
  }
  func.func @transform_6(%arg0: i32) -> (i32, i32, i32) {
    %c0_i32 = arith.constant 0 : i32
    %c0_i32_0 = arith.constant 0 : i32
    %c0_i32_1 = arith.constant 0 : i32
    return %arg0, %c0_i32, %c0_i32_0 : i32, i32, i32
  }
}

</mosaic_0001>

<bundles_post_ra>
// kernel: tpu_custom_call.1
= control target key start
LH: loop header
LB: loop body
LE: loop exit
PB: predicated region body
PF: predicated region fallthrough
CT: control target
= control target key end

     0   :  { %11 = vsyncpa [#allocation4], 0  ;;  %s804_s0 = inlined_call_operand.vmem [shape: f32[8,4], index: 0, kind: input, shape index: {}]   ;;  %s805_s1 = inlined_call_operand.vmem [shape: f32[1,4], index: 1, kind: input, shape index: {}]   ;;  %s806_s2 = inlined_call_operand.vmem [shape: f32[8,4], index: 2, kind: input, shape index: {}]   ;;  %s807_s3 = inlined_call_operand.vmem [shape: f32[1,8,1], index: 3, kind: input, shape index: {}]   ;;  %s808_s4 = inlined_call_operand.vmem [shape: f32[2], index: 4, kind: input, shape index: {}]   ;;  %s809_s5 = inlined_call_operand.vmem [shape: f32[2,8,256], index: 5, kind: input, shape index: {}]   ;;  %s810_s6 = inlined_call_operand.hbm [shape: f32[2,8,256], index: 6, kind: output, shape index: {}]  }
   0x1   :  { %12 = vsyncpa [#allocation3], 0 }
   0x2   :  { %14 = vsyncpa [#allocation3 + $0x1], 0  ;;  %s670_s21 = smov 0   ;;  %s672_s22 = smov 0  }
   0x3   :  { %s674_s23 = smov 0   ;;  %s676_s24 = smov 0  }
   0x4 LB: > { %s691_s25 = sadd.s32 4294967295, %s630_s24   ;;  %s468_s26 = sadd.s32 4294967294, %s630_s24   ;;  %s630_s24 = sphi %s676_s24, %s817_s24   ;;  %s626_s23 = sphi %s674_s23, %s816_s23   ;;  %s622_s22 = sphi %s672_s22, %s815_s22   ;;  %s618_s21 = sphi %s670_s21, %s814_s21  }
   0x5   : > { %s695_s27 = sadd.s32 1, %s630_s24   ;;  %s158_s28 = sadd.s32 1, %s626_s23 }
   0x6   : > { %s155_s29 = ssub.s32 %s630_s24, %s695_s27  ;;  %p168_p0 = scmp.ne.s32.totalorder %s626_s23, %s622_s22 }
   0x7   : > { %p156_p1 = scmp.eq.s32.totalorder %s155_s29, 0  ;;  %p169_p2 = scmp.eq.s32.totalorder %s691_s25, 1 }
   0x8   : > { %p174_p3 = scmp.ne.s32.totalorder %s622_s22, %s618_s21  ;;  %p175_p4 = scmp.eq.s32.totalorder %s468_s26, 1 }
   0x9   : > { %s706_s30 = scalar_select %p156_p1, %s626_s23, %s158_s28  }
   0xa   : > { %p708_p5 = por %p169_p2, %p168_p0  ;;  %p712_p6 = por %p175_p4, %p174_p3 }
   0xb   : > { %p469_p7 = scmp.ge.s32.totalorder %s630_s24, 1  ;;  %p182_p8 = scmp.lt.s32.totalorder %s630_s24, 3 }
   0xc   : > { %p499_p9 = scmp.eq.s32.totalorder %s691_s25, 0  ;;  %s207_s12 = sshll.u32 %s808_s4, 4  ;;  %s208_s12 = int_to_ptr.vmem [resolvable:$true] %s207_s12 }
   0xd   : > { %p719_p10 = pnand %p469_p7, %p182_p8  ;;  %s549_s13 = scalar_lea.vmem %s208_s12, 16 }
   0xe   : > { %p550_p13 = scmp.ne.s32.totalorder %s208_s12, %s549_s13  ;;  %p557_p3 = scmp.lt.s32.totalorder %s208_s12, %s208_s12 }
   0xf   : > { %p491_p11 = pneg %p719_p10  ;;  %p558_p4 = scmp.lt.s32.totalorder %s549_s13, %s549_s13 }
  0x11   : > { %p492_p12 = pnand %p499_p9, %p491_p11  ;;  %p559_p7 = por %p558_p4, %p557_p3 }
  0x13   : > { %p551_p0 = pneg %p492_p12 }
  0x15   : > { %p552_p1 = pnand %p551_p0, %p550_p13 }
  0x17   : > { %p553_p2 = pneg %p552_p1 }
  0x19   : > { %p560_p8 = pnand %p559_p7, %p553_p2 }
  0x1b   : > { %563 = shalt.err (!%p560_p8)
}
  0x1c   : > { %s632_s14 = smov [#allocation2]   ;;  %228 = sbr.rel (%p719_p10) target bundleno = 586 (0x24a), region = 44 }
  0x1d   : > { %494 = dma.vmem_to_smem (!%p492_p12), %s208_s12, 16, %s632_s14, [#allocation4]  }
  0x23   : > { %609 = dma.done.wait (%p499_p9), [#allocation4], 16  }
  0x24   : > { %611 = vsyncadd (%p499_p9), [#allocation4], 4294967280 }
  0x25   : > { %234 = sfence }
  0x26   : > { %p259_p11 = scmp.lt.s32.totalorder %s691_s25, 1  ;;  %v273_v5 = vld [vmem:[%s804_s0] sm:$0xff]  ;;  %vm278_vm0 = vcmask 31744   ;;  %v288_v17 = vlaneseq  ;;  %v633_v39 = vmov 0   ;;  %s356_s13 = sld [smem:[#allocation2]] }
  0x27   : > { %v274_v23 = vld [vmem:[%s805_s1] sm:$0x1]  ;;  %536 = vset.pattern.permute.xlu0 %v633_v39  ;;  %s477_s14 = sld [smem:[#allocation2 + $0x1]]  ;;  %s484_s17 = sshll.u32 %s691_s25, 8 }
  0x28   : > { %s260_s15 = scalar_select %p259_p11, %s691_s25, 1  ;;  %v289_v22 = vshrl.u32 %v288_v17, 7  ;;  %v275_v31 = vld [vmem:[%s806_s2] sm:$0xff] }
  0x29   : > { %v276_v41 = vld [vmem:[%s807_s3] sm:$0xff]  ;;  %s762_s28 = scalar_lea.hbm %s810_s6, %s484_s17  ;;  %s634_s9 = smov [#allocation5]  }
  0x2a   : > { %s483_s16 = sshll.u32 %s260_s15, 4  ;;  %v290_v28 = vsub.s32 0, %v289_v22  ;;  %s256_s15 = sand.u32 1, %s622_s22  }
  0x2b   : > { %s263_s19 = scalar_lea.vmem %s809_s5, %s483_s16  ;;  %s474_s16 = sshll.u32 %s256_s15, 4 }
  0x2c   : > { %v264_v0 = vld [vmem:[%s263_s19] sm:$0xff]  ;;  %v265_v1 = vld [vmem:[%s263_s19 + $0x8] sm:$0xff]  ;;  %s258_s18 = scalar_lea.vmem [#allocation5], %s474_s16  ;;  %s383_s29 = scalar_lea.sflag [#allocation3], %s256_s15 }
  0x2d   : > { %v266_v2 = vadd.f32 %v265_v1, %v264_v0  ;;  %v270_v3 = vmax.f32 %v264_v0, %v265_v1  ;;  %s397_s19 = sshll.u32 %s258_s18, 4  ;;  %s568_s10 = sshll.u32 %s634_s9, 4  ;;  %s764_s19 = int_to_ptr.vmem [resolvable:$true] %s397_s19  ;;  %s569_s10 = int_to_ptr.vmem [resolvable:$false] %s568_s10 }
  0x2e   : > { %s564_s25 = scalar_lea.vmem %s764_s19, 256  ;;  %s570_s11 = scalar_lea.vmem %s569_s10, 512 }
  0x2f   : > { %267 = vadd.xlane.f32.xlu0 %v266_v2  ;;  %p565_p9 = scmp.ne.s32.totalorder %s764_s19, %s564_s25  ;;  %p571_p13 = scmp.lt.s32.totalorder %s764_s19, %s569_s10 }
  0x30   : > { %p572_p0 = scmp.lt.s32.totalorder %s570_s11, %s564_s25 }
  0x31   : > { %p566_p10 = pnand %p565_p9, %p708_p5 }
  0x32   : > { %p573_p1 = por %p572_p0, %p571_p13 }
  0x33   : > { %271 = vmax.xlane.f32.xlu0 %v270_v3  ;;  %p567_p12 = pneg %p566_p10 }
  0x35   : > { %p574_p2 = pnand %p573_p1, %p567_p12 }
  0xbc   : > { %v268_v4 = vpop.xlane.xlu0 %267 }
  0xbd   : > { %v269_v6 = vmul.f32 0.00390625, %v268_v4 }
  0xbf   : > { %v277_v7 = vmul.f32 %v273_v5, %v269_v6 }
  0xc0   : > { %v272_v8 = vpop.xlane.xlu0 %271 }
  0xc1   : > { %v279_v9 = vsel %vm278_vm0, %v277_v7, 0.0  ;;  %v297_v10 = vmul.f32 %v273_v5, %v272_v8 }
  0xc2   : > { %v280_v11 = vrot.slane %v279_v9, 4 }
  0xc3   : > { %v298_v12 = vsel %vm278_vm0, %v297_v10, 0.0 }
  0xc4   : > { %v281_v13 = vadd.f32 %v280_v11, %v279_v9  ;;  %v299_v14 = vrot.slane %v298_v12, 4 }
  0xc6   : > { %v282_v15 = vrot.slane %v281_v13, 2  ;;  %v300_v16 = vadd.f32 %v299_v14, %v298_v12  ;;  %v357_v12 = vstv %s356_s13 }
  0xc8   : > { %v283_v18 = vadd.f32 %v282_v15, %v281_v13  ;;  %v301_v19 = vrot.slane %v300_v16, 2  ;;  %v361_v13 = vstv %s477_s14 }
  0xca   : > { %v284_v20 = vrot.slane %v283_v18, 1  ;;  %v302_v21 = vadd.f32 %v301_v19, %v300_v16 }
  0xcc   : > { %v303_v24 = vrot.slane %v302_v21, 1  ;;  %v285_v25 = vadd.f32 %v284_v20, %v283_v18 }
  0xce   : > { %v304_v26 = vadd.f32 %v303_v24, %v302_v21  ;;  %v286_v27 = vadd.f32 %v285_v25, %v274_v23 }
  0xd0   : > { %v287_v29 = vmax.f32 %v286_v27, 0.0  ;;  %v305_v30 = vadd.f32 %v304_v26, %v274_v23 }
  0xd2   : > { %v291_v32 = vrot.slane %v287_v29, %v290_v28  ;;  %v306_v33 = vmax.f32 %v305_v30, 0.0 }
  0xd4   : > { %v292_v34 = vmul.f32 %v291_v32, %v275_v31  ;;  %v310_v35 = vrot.slane %v306_v33, %v290_v28 }
  0xd6   : > { %v293_v36 = vsel %vm278_vm0, %v292_v34, 0.0  ;;  %v311_v37 = vmul.f32 %v310_v35, %v275_v31 }
  0xd7   : > { %294 = vadd.xlane.f32.xlu1 %v293_v36 }
  0xd8   : > { %v312_v38 = vsel %vm278_vm0, %v311_v37, 0.0 }
  0xdb   : > { %313 = vadd.xlane.f32.xlu1 %v312_v38 }
 0x164   : > { %v295_v40 = vpop.xlane.xlu1 %294 }
 0x165   : > { %v296_v43 = vadd.f32 %v295_v40, %v276_v41 }
 0x168   : > { %v314_v42 = vpop.xlane.xlu1 %313 }
 0x169   : > { %v315_v44 = vadd.f32 %v314_v42, %v276_v41 }
 0x16b   : > { %v316_v45 = vadd.f32 %v315_v44, %v296_v43 }
 0x16d   : > { %v317_v46 = vsub.f32 0.0, %v316_v45 }
 0x16f   : > { %v318_v47 = vmul.f32 1.442695, %v317_v46 }
 0x171   : > { %537 = vpow2.f32 %v318_v47 }
 0x17b   : > { %v538_v48 = vpop.eup %537 }
 0x17c   : > { %v320_v49 = vadd.f32 1.0, %v538_v48 }
 0x17e   : > { %539 = vrcp.f32 %v320_v49 }
 0x188   : > { %v540_v50 = vpop.eup %539 }
 0x189   : > { %325 = vperm.xlu0 %536, %v540_v50  }
 0x208   : > { %v326_v51 = vpop.permute.xlu0 %325 }
 0x209   : > { %v328_v52 = vmul.f32 %v326_v51, %v264_v0  ;;  %v329_v53 = vmul.f32 %v326_v51, %v265_v1 }
 0x20b   : > { %v330_v54 = vrot.slane %v328_v52, 4  ;;  %v336_v55 = vrot.slane %v329_v53, 4 }
 0x20d   : > { %v331_v56 = vmax.f32 %v328_v52, %v330_v54  ;;  %v337_v57 = vmax.f32 %v329_v53, %v336_v55  ;;  %v343_v58 = vadd.f32 %v330_v54, %v328_v52  ;;  %v349_v59 = vadd.f32 %v336_v55, %v329_v53 }
 0x20f   : > { %v332_v60 = vrot.slane %v331_v56, 2  ;;  %v338_v61 = vrot.slane %v337_v57, 2  ;;  %v344_v62 = vrot.slane %v343_v58, 2  ;;  %v350_v63 = vrot.slane %v349_v59, 2 }
 0x211   : > { %v333_v2 = vmax.f32 %v331_v56, %v332_v60  ;;  %v339_v3 = vmax.f32 %v337_v57, %v338_v61  ;;  %v345_v4 = vadd.f32 %v344_v62, %v343_v58  ;;  %v351_v5 = vadd.f32 %v350_v63, %v349_v59 }
 0x213   : > { %v334_v6 = vrot.slane %v333_v2, 1  ;;  %v340_v7 = vrot.slane %v339_v3, 1  ;;  %v346_v0 = vrot.slane %v345_v4, 1  ;;  %v352_v1 = vrot.slane %v351_v5, 1 }
 0x215   : > { %v335_v8 = vmax.f32 %v333_v2, %v334_v6  ;;  %v341_v9 = vmax.f32 %v339_v3, %v340_v7  ;;  %v347_v10 = vadd.f32 %v346_v0, %v345_v4  ;;  %v353_v11 = vadd.f32 %v352_v1, %v351_v5 }
 0x217   : > { %v354_v14 = vmul.f32 0.125, %v347_v10  ;;  %v355_v15 = vmul.f32 0.125, %v353_v11  ;;  %v358_v16 = vmul.f32 %v357_v12, %v335_v8  ;;  %v359_v17 = vmul.f32 %v357_v12, %v341_v9 }
 0x219   : > { %v362_v18 = vmul.f32 %v361_v13, %v354_v14  ;;  %v363_v19 = vmul.f32 %v361_v13, %v355_v15 }
 0x21b   : > { %v364_v20 = vadd.f32 %v362_v18, %v358_v16  ;;  %v365_v21 = vadd.f32 %v363_v19, %v359_v17 }
 0x21d   : > { %v366_v22 = vsub.f32 0.0, %v364_v20  ;;  %v367_v23 = vsub.f32 0.0, %v365_v21 }
 0x21f   : > { %v368_v24 = vmul.f32 1.442695, %v366_v22  ;;  %v370_v25 = vmul.f32 1.442695, %v367_v23 }
 0x221   : > { %541 = vpow2.f32 %v368_v24 }
 0x222   : > { %543 = vpow2.f32 %v370_v25 }
 0x22b   : > { %v542_v26 = vpop.eup %541 }
 0x22c   : > { %v544_v27 = vpop.eup %543  ;;  %v372_v28 = vadd.f32 1.0, %v542_v26 }
 0x22d   : > { %v373_v29 = vadd.f32 1.0, %v544_v27 }
 0x22e   : > { %545 = vrcp.f32 %v372_v28 }
 0x22f   : > { %547 = vrcp.f32 %v373_v29 }
 0x238   : > { %v546_v30 = vpop.eup %545 }
 0x239   : > { %v548_v31 = vpop.eup %547  ;;  %v378_v32 = vmul.f32 %v546_v30, %v328_v52 }
 0x23a   : > { %v379_v33 = vmul.f32 %v548_v31, %v329_v53 }
 0x23b   : > { %380 = vst [vmem:[%s258_s18] sm:$0xff] %v378_v32 }
 0x23c   : > { %381 = vst [vmem:[%s258_s18 + $0x8] sm:$0xff] %v379_v33 }
 0x23d   : > { %577 = shalt.err (!%p574_p2)
}
 0x23e   : > { %s578_s12 = scalar_lea.hbm %s762_s28, 256  ;;  %s582_s15 = scalar_lea.hbm %s810_s6, 512 }
 0x23f   : > { %p579_p3 = scmp.ne.s32.totalorder %s762_s28, %s578_s12  ;;  %p583_p8 = scmp.lt.u32.totalorder %s762_s28, %s810_s6 }
 0x240   : > { %p584_p11 = scmp.lt.u32.totalorder %s582_s15, %s578_s12  ;;  %p586_p10 = scmp.lt.u32.totalorder %s578_s12, %s762_s28 }
 0x241   : > { %p580_p4 = pnand %p579_p3, %p708_p5 }
 0x242   : > { %p585_p9 = por %p584_p11, %p583_p8 }
 0x243   : > { %p581_p7 = pneg %p580_p4 }
 0x244   : > { %p587_p12 = por %p586_p10, %p585_p9 }
 0x246   : > { %p588_p13 = pnand %p587_p12, %p581_p7 }
 0x248   : > { %591 = shalt.err (!%p588_p13)
}
 0x249   : > { %489 = dma.vmem_to_hbm [thread:$0]  (%p708_p5), %s764_s19, 256, %s762_s28, %s383_s29  }
 0x24a PF: > { %p501_p0 = scmp.ge.s32.totalorder %s630_s24, 2  ;;  %s409_s18 = sand.u32 1, %s618_s21  }
 0x24b   : > { %s410_s20 = scalar_lea.sflag [#allocation3], %s409_s18 }
 0x24c   : > { %p496_p1 = pnand %p501_p0, %p712_p6 }
 0x24e   : > { %613 = dma.done.wait (!%p496_p1), %s410_s20, 256  }
 0x24f   : > { %615 = vsyncadd (!%p496_p1), %s410_s20, 4294967040  ;;  %p17_p2 = scmp.ge.s32.totalorder %s695_s27, 4   ;;  %s814_s21 = smov %s622_s22 }
 0x250   : > { %s815_s22 = smov %s626_s23  ;;  %s816_s23 = smov %s706_s30 }
 0x251   : > { %s817_s24 = smov %s695_s27  ;;  %19 = sbr.rel (!%p17_p2) target bundleno = 4 (0x4), region = 84 }
 0x258   :  { %415 = vsyncpa [#allocation3], 1 }
 0x259   :  { %417 = vsyncpa [#allocation3 + $0x1], 1 }
 0x25a   :  { %418 = vsyncpa [#allocation4], 1 }
 0x25b   :  { %420 = vsyncpa [#allocation4 + $0x1], 1 }

</bundles_post_ra>
